<compile_context>
chip_gen: v7x
topology: tpu7x:2x2x1
jax: 0.10.0
libtpu: 0.0.40
codegen_flags: <defaults>
</compile_context>

<pallas_src>
import jax
import jax.numpy as jnp
from jax import lax
from jax.experimental import pallas as pl
from jax.experimental.pallas import tpu as pltpu


def _round_up(x, m):
    return (x + m - 1) // m * m


def _vmem_bytes(rows, cols, itemsize=4):
    """f32 VMEM footprint of a (rows, cols) tile after (8, 128) layout padding."""
    return _round_up(max(rows, 1), 8) * _round_up(max(cols, 1), 128) * itemsize


# ---------------------------------------------------------------------------------
# Fast path: tables resident in VMEM, one-hot MXU gather (no per-row DMA descriptors).
# ---------------------------------------------------------------------------------
def _make_resident_kernel(mu):
    def kernel(uids_ref, iids_ref, ut_ref, it_ref, ub_ref, ib_ref, out_ref):
        # uids/iids: (1, TB) int32 lane-dense 0-indexed ids for this batch tile.
        # ut/it:     (D, n_user) / (D, n_item) transposed latent tables (whole, in VMEM).
        # ub/ib:     (n_user, 1) / (n_item, 1) bias columns (whole, in VMEM).
        uids = uids_ref[...]
        iids = iids_ref[...]
        tb = uids.shape[1]
        n_u = ut_ref.shape[1]
        n_i = it_ref.shape[1]

        # One-hot selection matrices (n_rows, TB), reused for both the MXU latent gather
        # and the exact VPU bias gather.
        oh_u = (lax.broadcasted_iota(jnp.int32, (n_u, tb), 0) == uids).astype(jnp.float32)
        oh_i = (lax.broadcasted_iota(jnp.int32, (n_i, tb), 0) == iids).astype(jnp.float32)

        # Latent gather on the MXU: (D, n) @ (n, TB) -> (D, TB) gathered columns.
        u_cols = jnp.dot(ut_ref[...], oh_u, preferred_element_type=jnp.float32)
        i_cols = jnp.dot(it_ref[...], oh_i, preferred_element_type=jnp.float32)

        # Per-row biases gathered exactly on the VPU (keeps the N(0,1) biases out of any
        # reduced-precision f32 MXU pass).
        u_bias = jnp.sum(oh_u * ub_ref[...], axis=0, keepdims=True)   # (1, TB)
        i_bias = jnp.sum(oh_i * ib_ref[...], axis=0, keepdims=True)   # (1, TB)

        dots = jnp.sum(u_cols * i_cols, axis=0, keepdims=True)        # (1, TB) lane-dense
        out_ref[...] = (dots + u_bias + i_bias + mu).astype(out_ref.dtype)

    return kernel


# ---------------------------------------------------------------------------------
# Fallback: tables in HBM, double-buffered per-row DMA gather with aggregate waits.
# ---------------------------------------------------------------------------------
def _make_hbm_gather_kernel(tile_batch, d_pad, mu):
    def kernel(users_ref, items_ref,        # SMEM scalar-prefetch ids (0-indexed)
               u_tbl_ref, i_tbl_ref,        # augmented tables, left in HBM (pl.ANY)
               out_ref,                     # (1, TB) lane-dense output block
               ubuf, ibuf, sems):           # (2, TB, Dpad) double buffers + (2, 2) DMA sems
        t = pl.program_id(0)
        n_tiles = pl.num_programs(0)
        slot = t % 2
        nslot = 1 - slot

        def issue_tile(tile_idx, s):
            base = tile_idx * tile_batch

            def body(r, carry):
                uid = users_ref[base + r]
                iid = items_ref[base + r]
                # All TB row copies of one (table, slot) signal a single shared semaphore;
                # padded tail rows are gathered too (row 0) so the aggregate byte count
                # always equals one full (TB, Dpad) buffer.
                pltpu.make_async_copy(u_tbl_ref.at[pl.ds(uid, 1), :],
                                      ubuf.at[s, pl.ds(r, 1), :],
                                      sems.at[0, s]).start()
                pltpu.make_async_copy(i_tbl_ref.at[pl.ds(iid, 1), :],
                                      ibuf.at[s, pl.ds(r, 1), :],
                                      sems.at[1, s]).start()
                return carry

            # Unrolled issue loop: lets the scheduler co-issue SMEM id loads, address math
            # and descriptor pushes instead of paying per-row loop overhead.
            lax.fori_loop(0, tile_batch, body, 0, unroll=8)

        # Prime the pipeline with this step's tile on the first grid step only.
        @pl.when(t == 0)
        def _():
            issue_tile(0, slot)

        # Cross-tile prefetch: issue tile t+1's gather into the other slot *before* waiting
        # on tile t, so the next tile's HBM latency overlaps this tile's wait + compute.
        @pl.when(t + 1 < n_tiles)
        def _():
            issue_tile(t + 1, nslot)

        # Aggregate wait: one wait per table for the whole (TB, Dpad) buffer -- the same
        # total byte count as the TB row copies that signalled the shared semaphore.
        pltpu.make_async_copy(ubuf.at[slot], ubuf.at[slot], sems.at[0, slot]).wait()
        pltpu.make_async_copy(ibuf.at[slot], ibuf.at[slot], sems.at[1, slot]).wait()

        prod = ubuf[slot] * ibuf[slot]                                 # (TB, Dpad)
        # Row-wise reduce straight into lane layout: (1, Dpad) . (TB, Dpad)^T -> (1, TB),
        # so the output store is an unmasked lane-dense store.  The bias columns of the
        # augmented rows are included in the reduce; mu is added once.
        ones_row = jnp.ones((1, d_pad), jnp.float32)
        dots = lax.dot_general(ones_row, prod, (((1,), (1,)), ((), ())),
                               preferred_element_type=jnp.float32)     # (1, TB)
        out_ref[...] = (dots + mu).astype(out_ref.dtype)

    return kernel


def matrix_factorization_forward(users, items, params, *,
                                 tile_batch=512,
                                 max_resident_rows=2048,
                                 vmem_budget_bytes=12 * 1024 * 1024,
                                 core_parallel=False):
    """users, items: int (B,) 1-indexed ids (as in the PyTorch module, which subtracts 1).

    core_parallel=True switches the fast path's grid axis to pltpu.CORE_PARALLEL for
    explicit two-TensorCore sharding on v7x (leave False on single-TensorCore chips).
    vmem_budget_bytes defaults to 12 MiB so the resident-table fast path fits under every
    generation's scoped-VMEM default (v5e 16 MiB, v6e/v7x 32 MiB) without flags.
    """
    u_lat = params["user_latent"].astype(jnp.float32)    # (n_user, D)
    i_lat = params["item_latent"].astype(jnp.float32)    # (n_item, D)
    u_bias = params["user_bias"].astype(jnp.float32)     # (n_user, 1)
    i_bias = params["item_bias"].astype(jnp.float32)     # (n_item, 1)
    mu = float(params["mu"])

    n_user, d = u_lat.shape
    n_item = i_lat.shape[0]

    users0 = (users - 1).astype(jnp.int32)
    items0 = (items - 1).astype(jnp.int32)
    b = users0.shape[0]

    # ---- resident-table fast path? -------------------------------------------------
    # TB is capped at 256 here because the one-hot intermediates scale with n_rows * TB.
    tb_fast = min(_round_up(tile_batch, 128), 256, _round_up(b, 128))
    fast_bytes = (
        2 * (_vmem_bytes(d, n_user) + _vmem_bytes(d, n_item)        # double-buffered tables
             + _vmem_bytes(n_user, 1) + _vmem_bytes(n_item, 1))     # + bias columns
        + _vmem_bytes(n_user, tb_fast) + _vmem_bytes(n_item, tb_fast)   # one-hot matrices
        + 4 * _vmem_bytes(d, tb_fast)                               # gathered cols + product
        + 2 * _vmem_bytes(1, tb_fast)                               # output block
    )
    use_resident = (max(n_user, n_item) <= max_resident_rows
                    and fast_bytes <= vmem_budget_bytes)

    if use_resident:
        tb = tb_fast
        b_pad = _round_up(b, tb)
        n_tiles = b_pad // tb
        uids = jnp.pad(users0, (0, b_pad - b)).reshape(1, b_pad)    # pad with row 0 (discarded)
        iids = jnp.pad(items0, (0, b_pad - b)).reshape(1, b_pad)

        dims = (pltpu.CORE_PARALLEL,) if core_parallel else ("parallel",)
        out = pl.pallas_call(
            _make_resident_kernel(mu),
            out_shape=jax.ShapeDtypeStruct((1, b_pad), jnp.float32),
            grid=(n_tiles,),
            in_specs=[
                pl.BlockSpec((1, tb), lambda i: (0, i)),            # user ids (lane-dense)
                pl.BlockSpec((1, tb), lambda i: (0, i)),            # item ids (lane-dense)
                pl.BlockSpec((d, n_user), lambda i: (0, 0)),        # user latents^T (resident)
                pl.BlockSpec((d, n_item), lambda i: (0, 0)),        # item latents^T (resident)
                pl.BlockSpec((n_user, 1), lambda i: (0, 0)),        # user bias (resident)
                pl.BlockSpec((n_item, 1), lambda i: (0, 0)),        # item bias (resident)
            ],
            out_specs=pl.BlockSpec((1, tb), lambda i: (0, i)),
            compiler_params=pltpu.CompilerParams(dimension_semantics=dims),
        )(uids, iids, u_lat.T, i_lat.T, u_bias, i_bias)
        return out[0, :b]

    # ---- HBM fallback: fused DMA row gather (large tables) --------------------------
    tb = min(_round_up(tile_batch, 128), _round_up(b, 128))
    b_pad = _round_up(b, tb)
    n_tiles = b_pad // tb
    users_pad = jnp.pad(users0, (0, b_pad - b))
    items_pad = jnp.pad(items0, (0, b_pad - b))

    # Fold the biases into the gathered rows (user row: [latent, bias, 1]; item row:
    # [latent, 1, bias]) and pad the feature axis to a 128-lane multiple so every row DMA is
    # a clean 512 B multiple and the aggregate-wait byte counts line up exactly.
    d_aug = d + 2
    d_pad = _round_up(d_aug, 128)
    u_aug = jnp.concatenate([u_lat, u_bias, jnp.ones((n_user, 1), jnp.float32)], axis=1)
    i_aug = jnp.concatenate([i_lat, jnp.ones((n_item, 1), jnp.float32), i_bias], axis=1)
    u_aug = jnp.pad(u_aug, ((0, 0), (0, d_pad - d_aug)))
    i_aug = jnp.pad(i_aug, ((0, 0), (0, d_pad - d_aug)))

    grid_spec = pltpu.PrefetchScalarGridSpec(
        num_scalar_prefetch=2,                      # users_pad, items_pad -> SMEM
        grid=(n_tiles,),
        in_specs=[
            pl.BlockSpec(memory_space=pl.ANY),      # augmented user table (HBM, manual DMA)
            pl.BlockSpec(memory_space=pl.ANY),      # augmented item table (HBM, manual DMA)
        ],
        out_specs=pl.BlockSpec((1, tb), lambda i, u_ids, i_ids: (0, i)),
        scratch_shapes=[
            pltpu.VMEM((2, tb, d_pad), jnp.float32),    # double-buffered gathered user rows
            pltpu.VMEM((2, tb, d_pad), jnp.float32),    # double-buffered gathered item rows
            pltpu.SemaphoreType.DMA((2, 2)),            # one shared sem per (table, slot)
        ],
    )
    out = pl.pallas_call(
        _make_hbm_gather_kernel(tb, d_pad, mu),
        out_shape=jax.ShapeDtypeStruct((1, b_pad), jnp.float32),
        grid_spec=grid_spec,
        # Cross-step prefetch carries buffer state between grid steps -> "arbitrary" axis.
        compiler_params=pltpu.CompilerParams(dimension_semantics=("arbitrary",)),
    )(users_pad, items_pad, u_aug, i_aug)
    return out[0, :b]


def init_params(key, n_user, n_item, dim, mu):
    k1, k2, k3, k4 = jax.random.split(key, 4)
    return {
        # Embedding weights ~ N(0, 0.02); biases ~ N(0, 1), as in init_embedding().
        "user_latent": 0.02 * jax.random.normal(k1, (n_user, dim), jnp.float32),
        "item_latent": 0.02 * jax.random.normal(k2, (n_item, dim), jnp.float32),
        "user_bias": jax.random.normal(k3, (n_user, 1), jnp.float32),
        "item_bias": jax.random.normal(k4, (n_item, 1), jnp.float32),
        "mu": float(mu),
    }


def _reference(users, items, params):
    # Pure-JAX reference: exact f32 elementwise equivalent of diag(U @ I^T) + biases + mu.
    u = jnp.take(params["user_latent"], users - 1, axis=0)
    i = jnp.take(params["item_latent"], items - 1, axis=0)
    ub = jnp.take(params["user_bias"][:, 0], users - 1, axis=0)
    ib = jnp.take(params["item_bias"][:, 0], items - 1, axis=0)
    return jnp.sum(u * i, axis=1) + ub + ib + params["mu"]


if __name__ == "__main__":
    key = jax.random.PRNGKey(0)
    n_user, n_item, dim = 16, 24, 32
    mu = 3.5  # stand-in for train_data['rating'].mean()

    kp, k1, k2, k3, k4 = jax.random.split(key, 5)
    params = init_params(kp, n_user, n_item, dim, mu)

    # Small batch (exercises tail padding) and a multi-tile batch (exercises the grid).
    for bsz, ku, ki in ((10, k1, k2), (300, k3, k4)):
        users = jax.random.randint(ku, (bsz,), 1, n_user + 1, dtype=jnp.int32)
        items = jax.random.randint(ki, (bsz,), 1, n_item + 1, dtype=jnp.int32)
        ratings = jax.block_until_ready(matrix_factorization_forward(users, items, params))
        ref = _reference(users, items, params)
        assert ratings.shape == (bsz,)
        # Tolerance allows for a possible reduced-precision f32 MXU pass in the one-hot
        # gather matmul; biases and mu are added exactly on the VPU.
        assert jnp.allclose(ratings, ref, atol=1e-3, rtol=1e-3), (bsz, ratings, ref)
    print("KERNEL_OK")
</pallas_src>

<mosaic_0001>
module attributes {stable_mosaic.version = 11 : i64} {
  func.func @kernel(%arg0: i32, %arg1: memref<1x128xi32, #tpu.memory_space<vmem>>, %arg2: memref<1x128xi32, #tpu.memory_space<vmem>>, %arg3: memref<32x16xf32, #tpu.memory_space<vmem>>, %arg4: memref<32x24xf32, #tpu.memory_space<vmem>>, %arg5: memref<16x1xf32, #tpu.memory_space<vmem>>, %arg6: memref<24x1xf32, #tpu.memory_space<vmem>>, %arg7: memref<1x128xf32, #tpu.memory_space<vmem>>) attributes {dimension_semantics = [#tpu.dimension_semantics<parallel>], iteration_bounds = array<i64: 1>, scalar_prefetch = 0 : i64, scratch_operands = 0 : i64, tpu.core_type = #tpu.core_type<tc>, window_params = [{transform_indices = @transform_0, window_bounds = array<i64: 1, 128>}, {transform_indices = @transform_1, window_bounds = array<i64: 1, 128>}, {pipeline_mode = #tpu.pipeline_mode<synchronous>, transform_indices = @transform_2, window_bounds = array<i64: 32, 16>}, {pipeline_mode = #tpu.pipeline_mode<synchronous>, transform_indices = @transform_3, window_bounds = array<i64: 32, 24>}, {pipeline_mode = #tpu.pipeline_mode<synchronous>, transform_indices = @transform_4, window_bounds = array<i64: 16, 1>}, {pipeline_mode = #tpu.pipeline_mode<synchronous>, transform_indices = @transform_5, window_bounds = array<i64: 24, 1>}, {transform_indices = @transform_6, window_bounds = array<i64: 1, 128>}]} {
    %c0 = arith.constant 0 : index
    %c0_0 = arith.constant 0 : index
    %0 = vector.load %arg1[%c0, %c0_0] : memref<1x128xi32, #tpu.memory_space<vmem>>, vector<1x128xi32>
    %c0_1 = arith.constant 0 : index
    %c0_2 = arith.constant 0 : index
    %1 = vector.load %arg2[%c0_1, %c0_2] : memref<1x128xi32, #tpu.memory_space<vmem>>, vector<1x128xi32>
    %2 = tpu.iota {dimensions = array<i32: 0>} : vector<16x128xi32>
    %3 = vector.broadcast %0 : vector<1x128xi32> to vector<16x128xi32>
    %4 = arith.cmpi eq, %2, %3 : vector<16x128xi32>
    %5 = arith.extui %4 : vector<16x128xi1> to vector<16x128xi32>
    %6 = arith.sitofp %5 : vector<16x128xi32> to vector<16x128xf32>
    %7 = tpu.iota {dimensions = array<i32: 0>} : vector<24x128xi32>
    %8 = vector.broadcast %1 : vector<1x128xi32> to vector<24x128xi32>
    %9 = arith.cmpi eq, %7, %8 : vector<24x128xi32>
    %10 = arith.extui %9 : vector<24x128xi1> to vector<24x128xi32>
    %11 = arith.sitofp %10 : vector<24x128xi32> to vector<24x128xf32>
    %c0_3 = arith.constant 0 : index
    %c0_4 = arith.constant 0 : index
    %12 = vector.load %arg3[%c0_3, %c0_4] : memref<32x16xf32, #tpu.memory_space<vmem>>, vector<32x16xf32>
    %cst = arith.constant dense<0.000000e+00> : vector<32x128xf32>
    %13 = tpu.matmul %12, %6, %cst {dimension_numbers = #tpu.dot_dimension_numbers<[1], [0], [0], [1], [0, 0, 1, 1], [], []>} : vector<32x16xf32>, vector<16x128xf32>, vector<32x128xf32> -> vector<32x128xf32>
    %c0_5 = arith.constant 0 : index
    %c0_6 = arith.constant 0 : index
    %14 = vector.load %arg4[%c0_5, %c0_6] : memref<32x24xf32, #tpu.memory_space<vmem>>, vector<32x24xf32>
    %cst_7 = arith.constant dense<0.000000e+00> : vector<32x128xf32>
    %15 = tpu.matmul %14, %11, %cst_7 {dimension_numbers = #tpu.dot_dimension_numbers<[1], [0], [0], [1], [0, 0, 1, 1], [], []>} : vector<32x24xf32>, vector<24x128xf32>, vector<32x128xf32> -> vector<32x128xf32>
    %c0_8 = arith.constant 0 : index
    %c0_9 = arith.constant 0 : index
    %16 = vector.load %arg5[%c0_8, %c0_9] : memref<16x1xf32, #tpu.memory_space<vmem>>, vector<16x1xf32>
    %17 = vector.broadcast %16 : vector<16x1xf32> to vector<16x128xf32>
    %18 = arith.mulf %6, %17 : vector<16x128xf32>
    %cst_10 = arith.constant dense<0.000000e+00> : vector<128xf32>
    %19 = vector.multi_reduction <add>, %18, %cst_10 [0] : vector<16x128xf32> to vector<128xf32>
    %20 = vector.shape_cast %19 : vector<128xf32> to vector<1x128xf32>
    %c0_11 = arith.constant 0 : index
    %c0_12 = arith.constant 0 : index
    %21 = vector.load %arg6[%c0_11, %c0_12] : memref<24x1xf32, #tpu.memory_space<vmem>>, vector<24x1xf32>
    %22 = vector.broadcast %21 : vector<24x1xf32> to vector<24x128xf32>
    %23 = arith.mulf %11, %22 : vector<24x128xf32>
    %cst_13 = arith.constant dense<0.000000e+00> : vector<128xf32>
    %24 = vector.multi_reduction <add>, %23, %cst_13 [0] : vector<24x128xf32> to vector<128xf32>
    %25 = vector.shape_cast %24 : vector<128xf32> to vector<1x128xf32>
    %26 = arith.mulf %13, %15 : vector<32x128xf32>
    %cst_14 = arith.constant dense<0.000000e+00> : vector<128xf32>
    %27 = vector.multi_reduction <add>, %26, %cst_14 [0] : vector<32x128xf32> to vector<128xf32>
    %28 = vector.shape_cast %27 : vector<128xf32> to vector<1x128xf32>
    %29 = arith.addf %28, %20 : vector<1x128xf32>
    %30 = arith.addf %29, %25 : vector<1x128xf32>
    %cst_15 = arith.constant 3.500000e+00 : f32
    %31 = vector.broadcast %cst_15 : f32 to vector<1x128xf32>
    %32 = arith.addf %30, %31 : vector<1x128xf32>
    %c0_16 = arith.constant 0 : index
    %c0_17 = arith.constant 0 : index
    %33 = vector.load %arg7[%c0_16, %c0_17] : memref<1x128xf32, #tpu.memory_space<vmem>>, vector<1x128xf32>
    tpu.vector_store %arg7[%c0_16, %c0_17], %32 {strides = array<i32>} : memref<1x128xf32, #tpu.memory_space<vmem>>, vector<1x128xf32>,
    return
  }
  func.func @transform_0(%arg0: i32) -> (i32, i32) {
    %c0_i32 = arith.constant 0 : i32
    %c0_i32_0 = arith.constant 0 : i32
    return %c0_i32, %arg0 : i32, i32
  }
  func.func @transform_1(%arg0: i32) -> (i32, i32) {
    %c0_i32 = arith.constant 0 : i32
    %c0_i32_0 = arith.constant 0 : i32
    return %c0_i32, %arg0 : i32, i32
  }
  func.func @transform_2(%arg0: i32) -> (i32, i32) {
    %c0_i32 = arith.constant 0 : i32
    %c0_i32_0 = arith.constant 0 : i32
    %c0_i32_1 = arith.constant 0 : i32
    return %c0_i32, %c0_i32_0 : i32, i32
  }
  func.func @transform_3(%arg0: i32) -> (i32, i32) {
    %c0_i32 = arith.constant 0 : i32
    %c0_i32_0 = arith.constant 0 : i32
    %c0_i32_1 = arith.constant 0 : i32
    return %c0_i32, %c0_i32_0 : i32, i32
  }
  func.func @transform_4(%arg0: i32) -> (i32, i32) {
    %c0_i32 = arith.constant 0 : i32
    %c0_i32_0 = arith.constant 0 : i32
    %c0_i32_1 = arith.constant 0 : i32
    return %c0_i32, %c0_i32_0 : i32, i32
  }
  func.func @transform_5(%arg0: i32) -> (i32, i32) {
    %c0_i32 = arith.constant 0 : i32
    %c0_i32_0 = arith.constant 0 : i32
    %c0_i32_1 = arith.constant 0 : i32
    return %c0_i32, %c0_i32_0 : i32, i32
  }
  func.func @transform_6(%arg0: i32) -> (i32, i32) {
    %c0_i32 = arith.constant 0 : i32
    %c0_i32_0 = arith.constant 0 : i32
    return %c0_i32, %arg0 : i32, i32
  }
}

</mosaic_0001>

<bundles_post_ra>
// kernel: tpu_custom_call.1
= control target key start
LH: loop header
LB: loop body
LE: loop exit
PB: predicated region body
PF: predicated region fallthrough
CT: control target
= control target key end

     0   :  { %v26_v0 = vlaneseq  ;;  %vm57_vm0 = vcmask 130048   ;;  %vm159_vm1 = vcmask 195584   ;;  %v432_v6 = vmov 0   ;;  %s560_s0 = inlined_call_operand.vmem [shape: s32[1,128], index: 0, kind: input, shape index: {}]   ;;  %s561_s1 = inlined_call_operand.vmem [shape: s32[1,128], index: 1, kind: input, shape index: {}]   ;;  %s562_s2 = inlined_call_operand.vmem [shape: f32[32,16], index: 2, kind: input, shape index: {}]   ;;  %s563_s3 = inlined_call_operand.vmem [shape: f32[32,24], index: 3, kind: input, shape index: {}]   ;;  %s564_s4 = inlined_call_operand.vmem [shape: f32[16,1], index: 4, kind: input, shape index: {}]   ;;  %s565_s5 = inlined_call_operand.vmem [shape: f32[24,1], index: 5, kind: input, shape index: {}]   ;;  %s566_s6 = inlined_call_operand.hbm [shape: f32[1,128], index: 6, kind: output, shape index: {}]  }
   0x1   :  { %v475_v1 = vld [vmem:[%s561_s1] ss:$0 sm:$0xff]  ;;  %406 = vset.pattern.permute.xlu0 %v432_v6  ;;  %407 = vset.pattern.permute.xlu1 %v432_v6  ;;  %v258_v11 = vld [vmem:[%s564_s4 + $0x8] sm:$0xff] }
   0x2   :  { %v53_v2 = vld [vmem:[%s562_s2] sm:$0xff]  ;;  %v27_v4 = vshrl.u32 %v26_v0, 7 }
   0x3   :  { %v155_v3 = vld [vmem:[%s563_s3] sm:$0xff]  ;;  %375 = vmatprep.mubr.msk.f32.mxu0 %vm57_vm0, %v53_v2 }
   0x4   :  { %v338_v5 = vld [vmem:[%s560_s0] ss:$0 sm:$0xff]  ;;  %387 = vmatprep.mubr.msk.f32.mxu1 %vm159_vm1, %v155_v3  ;;  %v28_v8 = vadd.s32 8, %v27_v4  ;;  %vm44_vm2 = vcmp.eq.s32.totalorder %v27_v4, %v475_v1  ;;  %v39_v9 = vadd.s32 16, %v27_v4 }
   0x5   :  { %v257_v7 = vld [vmem:[%s564_s4] sm:$0xff]  ;;  %vm33_vm3 = vcmp.eq.s32.totalorder %v27_v4, %v338_v5 }
   0x6   :  { %261 = vperm.xlu0 %406, %v257_v7   ;;  %v278_v10 = vld [vmem:[%s565_s5] sm:$0xff] }
   0x7   :  { %283 = vperm.xlu1 %407, %v278_v10  }
   0x8   :  { %11 = vsyncpa [#allocation3], 0  ;;  %vm45_vm4 = vcmp.eq.s32.totalorder %v28_v8, %v475_v1  ;;  %vm34_vm5 = vcmp.eq.s32.totalorder %v28_v8, %v338_v5  ;;  %vm46_vm7 = vcmp.eq.s32.totalorder %v39_v9, %v475_v1  ;;  %v433_v12 = vmov 1.0|1.0   ;;  %v279_v13 = vld [vmem:[%s565_s5 + $0x8] sm:$0xff]  ;;  %v280_v14 = vld [vmem:[%s565_s5 + $0x10] sm:$0xff] }
   0x9   :  { %vm397_vm6 = vmpackc.low %vm45_vm4, %vm44_vm2  ;;  %v434_v15 = vmov 1.0   ;;  %v54_v16 = vld [vmem:[%s562_s2 + $0x8] sm:$0xff]  ;;  %v55_v18 = vld [vmem:[%s562_s2 + $0x10] sm:$0xff]  ;;  %v435_v23 = vmov 0.0  }
   0xa   :  { %398 = vmatprep.subr.msk.bf16.mxu1 %vm397_vm6, %v433_v12  ;;  %vm393_vm8 = vmpackc.low %vm34_vm5, %vm33_vm3  ;;  %266 = vperm.xlu0 %406, %v258_v11   ;;  %v156_v17 = vld [vmem:[%s563_s3 + $0x8] sm:$0xff]  ;;  %v157_v19 = vld [vmem:[%s563_s3 + $0x10] sm:$0xff]  ;;  %v339_v24 = vsel %vm33_vm3, 1.0, %v435_v23  ;;  %v340_v26 = vsel %vm34_vm5, 1.0, %v435_v23  ;;  %v342_v28 = vsel %vm44_vm2, 1.0, %v435_v23  ;;  %v343_v31 = vsel %vm45_vm4, 1.0, %v435_v23 }
   0xb   :  { %394 = vmatprep.subr.msk.bf16.mxu0 %vm393_vm8, %v433_v12  ;;  %400 = vmatpush3.bf16.msk.msra.mxu1 %vm397_vm6, %v433_v12  ;;  %v56_v20 = vld [vmem:[%s562_s2 + $0x18] sm:$0xff]  ;;  %v344_v33 = vsel %vm46_vm7, 1.0, %v435_v23  ;;  %s436_s2 = smov [#allocation2]  }
   0xc   :  { %396 = vmatpush3.bf16.msk.msra.mxu0 %vm393_vm8, %v433_v12  ;;  %385 = vmatprep.subr.msk.mxu1 %vm46_vm7, %v434_v15  ;;  %v158_v21 = vld [vmem:[%s563_s3 + $0x18] sm:$0xff]  ;;  %s330_s3 = sshll.u32 %s436_s2, 4  ;;  %s331_s3 = int_to_ptr.vmem [resolvable:$true] %s330_s3 }
   0xd   :  { %288 = vperm.xlu1 %407, %v279_v13   ;;  %s408_s23 = scalar_lea.vmem %s331_s3, 16  ;;  %s412_s24 = scalar_lea.vmem %s331_s3, 32 }
   0xe   :  { %293 = vperm.xlu0 %406, %v280_v14   ;;  %p409_p0 = scmp.ne.s32.totalorder %s331_s3, %s408_s23  ;;  %p413_p1 = scmp.lt.s32.totalorder %s331_s3, %s331_s3 }
   0xf   :  { %376 = vmatmul.mubr.msk.f32.vlgmr.msra.gmra.mrb[0].mxu0 %vm57_vm0, %v54_v16  ;;  %386 = vmatpush3.msk.msra.mxu1 %vm46_vm7, %v434_v15  ;;  %p414_p2 = scmp.lt.s32.totalorder %s412_s24, %s408_s23 }
  0x10   :  { %388 = vmatmul.mubr.msk.f32.vlgmr.msra.gmra.mrb[0].mxu1 %vm159_vm1, %v156_v17  ;;  %378 = vmatprep.mubr.msk.f32.mxu0 %vm57_vm0, %v55_v18 }
  0x11   :  { %390 = vmatprep.mubr.msk.f32.mxu1 %vm159_vm1, %v157_v19  ;;  %p415_p3 = por %p414_p2, %p413_p1 }
  0x13   :  { %379 = vmatmul.mubr.msk.f32.gmra.mrb[2].mxu0 %vm57_vm0, %v56_v20  ;;  %p416_p4 = pnand %p415_p3, %p409_p0 }
  0x14   :  { %391 = vmatmul.mubr.msk.f32.gmra.mrb[2].mxu1 %vm159_vm1, %v158_v21 }
  0x85   :  { %v262_v22 = vpop.permute.xlu0 %261 }
  0x86   :  { %v284_v25 = vpop.permute.xlu1 %283  ;;  %v269_v27 = vmul.f32 %v339_v24, %v262_v22 }
  0x87   :  { %v296_v32 = vmul.f32 %v342_v28, %v284_v25 }
  0x89   :  { %v267_v29 = vpop.permute.xlu0 %266 }
  0x8a   :  { %v270_v30 = vmul.f32 %v340_v26, %v267_v29 }
  0x8c   :  { %v271_v34 = vadd.f32 %v270_v30, %v269_v27  ;;  %v289_v35 = vpop.permute.xlu1 %288 }
  0x8d   :  { %v297_v36 = vmul.f32 %v343_v31, %v289_v35  ;;  %v294_v37 = vpop.permute.xlu0 %293 }
  0x8e   :  { %v298_v38 = vmul.f32 %v344_v33, %v294_v37  ;;  %v272_v46 = vrot.slane %v271_v34, 4 }
  0x8f   :  { %v299_v39 = vadd.f32 %v297_v36, %v296_v32 }
  0x90   :  { %v273_v55 = vadd.f32 %v272_v46, %v271_v34 }
  0x91   :  { %v300_v40 = vadd.f32 %v299_v39, %v298_v38 }
  0x92   :  { %v274_v59 = vrot.slane %v273_v55, 2 }
  0x93   :  { %v301_v49 = vrot.slane %v300_v40, 4 }
  0x94   :  { %v275_v63 = vadd.f32 %v274_v59, %v273_v55 }
  0x95   :  { %v302_v57 = vadd.f32 %v301_v49, %v300_v40 }
  0x96   :  { %v276_v3 = vrot.slane %v275_v63, 1 }
  0x97   :  { %v303_v61 = vrot.slane %v302_v57, 2 }
  0x98   :  { %v277_v7 = vadd.f32 %v276_v3, %v275_v63 }
  0x99   :  { %v304_v1 = vadd.f32 %v303_v61, %v302_v57 }
  0x9b   :  { %v305_v5 = vrot.slane %v304_v1, 1 }
  0x9d   :  { %v306_v9 = vadd.f32 %v305_v5, %v304_v1 }
  0xe2   :  { %v377_v41 = vpop.f32.mrb[0].mxu0 }
  0xe3   :  { %v136_v42 = vpop.f32.mrb[1].mxu0  ;;  %v389_v43 = vpop.f32.mrb[0].mxu1 }
  0xe4   :  { %v308_v44 = vmul.f32 %v389_v43, %v377_v41  ;;  %v238_v45 = vpop.f32.mrb[1].mxu1 }
  0xe5   :  { %v307_v47 = vmul.f32 %v238_v45, %v136_v42 }
  0xe6   :  { %v380_v48 = vpop.f32.mrb[2].mxu0 }
  0xe7   :  { %v311_v50 = vadd.f32 %v308_v44, %v307_v47  ;;  %v146_v51 = vpop.f32.mrb[3].mxu0  ;;  %v392_v52 = vpop.f32.mrb[2].mxu1 }
  0xe8   :  { %v310_v53 = vmul.f32 %v392_v52, %v380_v48  ;;  %v248_v54 = vpop.f32.mrb[3].mxu1 }
  0xe9   :  { %v309_v56 = vmul.f32 %v248_v54, %v146_v51 }
  0xeb   :  { %v312_v58 = vadd.f32 %v311_v50, %v309_v56 }
  0xed   :  { %v313_v60 = vadd.f32 %v312_v58, %v310_v53 }
  0xef   :  { %v314_v62 = vrot.slane %v313_v60, 4 }
  0xf1   :  { %v315_v0 = vadd.f32 %v314_v62, %v313_v60 }
  0xf3   :  { %v316_v2 = vrot.slane %v315_v0, 2 }
  0xf5   :  { %v317_v4 = vadd.f32 %v316_v2, %v315_v0 }
  0xf7   :  { %v318_v6 = vrot.slane %v317_v4, 1 }
  0xf9   :  { %v319_v8 = vadd.f32 %v318_v6, %v317_v4 }
  0xfb   :  { %v320_v10 = vadd.f32 %v319_v8, %v277_v7 }
  0xfd   :  { %v321_v11 = vadd.f32 %v320_v10, %v306_v9 }
  0xff   :  { %v322_v12 = vadd.f32 3.5, %v321_v11 }
 0x101   :  { %323 = vst [vmem:[#allocation2] sm:$0x1] %v322_v12 }
 0x102   :  { %419 = shalt.err (!%p416_p4)
}
 0x103   :  { %s420_s27 = scalar_lea.hbm %s566_s6, 16 }
 0x104   :  { %p421_p5 = scmp.ne.s32.totalorder %s566_s6, %s420_s27  ;;  %p424_p6 = scmp.lt.u32.totalorder %s420_s27, %s566_s6 }
 0x106   :  { %p426_p7 = pnand %p424_p6, %p421_p5 }
 0x108   :  { %429 = shalt.err (!%p426_p7)
}
 0x109   :  { %333 = dma.vmem_to_hbm [thread:$0]  %s331_s3, 16, %s566_s6, [#allocation3]  }
 0x10a   :  { %430 = dma.done.wait [#allocation3], 16  }
 0x10b   :  { %431 = vsyncadd [#allocation3], 4294967280 }
 0x10c   :  { %337 = vsyncpa [#allocation3], 1 }

</bundles_post_ra>
